<compile_context>
chip_gen: v6e
topology: v6e:2x2x1
jax: 0.10.0
libtpu: 0.0.40
codegen_flags: <defaults>
</compile_context>

<pallas_src>
import jax
import jax.numpy as jnp
from jax.experimental import pallas as pl
from jax.experimental.pallas import tpu as pltpu


def _round_up(x, m):
    return ((x + m - 1) // m) * m


def _make_kernel(pack, out_dim):
    def kernel(xp_ref, wblk_ref, fb_ref, o_ref):
        # xp_ref : (TP, pack*D)    wblk_ref : (pack*D, pack*out_dim)
        # fb_ref : (1, pack*out_dim)   o_ref : (TP, pack*out_dim)
        s = jnp.dot(xp_ref[...], wblk_ref[...],
                    preferred_element_type=jnp.float32) + fb_ref[...]
        tp = s.shape[0]
        # Segmented, numerically-stable softmax: each packed row holds `pack`
        # independent rows of `out_dim` logits.
        # TODO(synk): if the (TP, pack, out_dim) relayout shows up in HW
        # profiles, replace it with a masked pltpu.roll max-tree + group-ones
        # matmul segmented reduction (reshape-free, XLU/MXU only).
        s3 = s.reshape(tp, pack, out_dim)
        m = jnp.max(s3, axis=-1, keepdims=True)
        e = jnp.exp(s3 - m)
        denom = jnp.sum(e, axis=-1, keepdims=True)
        p = (e / denom).reshape(tp, pack * out_dim)      # exact divide
        o_ref[...] = p.astype(o_ref.dtype)
    return kernel


def f_nodes_forward(x, h_v, w, b, *, tile_n=32768, out_dtype=None):
    """Forward pass of f_nodes.

    x   : (N, D)     float32 node features
    h_v : (D,)       float32 broadcast feature
    w   : (20, 2*D)  float32 Linear weight (PyTorch (out, in) layout)
    b   : (20,)      float32 Linear bias
    """
    n, d = x.shape
    out_dim = w.shape[0]
    if out_dtype is None:
        out_dtype = x.dtype   # TODO(synk): pass jnp.bfloat16 if the consumer tolerates it.

    # Rows packed per lane-row so the minor dims become lane-dense (D=16 -> 8).
    pack = 128 // d if 128 % d == 0 else 8

    # --- one-time parameter prep (constant-folds under jit) -----------------
    w_x = jnp.transpose(w[:, :d]).astype(jnp.float32)          # (D, out)
    w_h = jnp.transpose(w[:, d:]).astype(jnp.float32)          # (D, out)
    fused_b = (h_v.reshape(1, d).astype(jnp.float32) @ w_h
               + b.reshape(1, out_dim).astype(jnp.float32))    # (1, out)
    eye = jnp.eye(pack, dtype=jnp.float32)
    # Block-diagonal weight: block q on the diagonal == w_x.
    w_blk = jnp.einsum("pq,io->piqo", eye, w_x).reshape(pack * d,
                                                        pack * out_dim)
    fb_tiled = jnp.tile(fused_b, (1, pack))                    # (1, pack*out)

    # --- pack rows: pad only to a multiple of `pack` (<= pack-1 rows) --------
    n_pad = _round_up(n, pack)
    xf = x.astype(jnp.float32)
    if n_pad != n:
        xf = jnp.pad(xf, ((0, n_pad - n), (0, 0)))
    rows_p = n_pad // pack
    xp = xf.reshape(rows_p, pack * d)          # free row-major reshape

    # --- packed-row tile ------------------------------------------------------
    tp = max(1, tile_n // pack)
    if tp >= rows_p:
        tp = rows_p                            # single block == full extent
    else:
        tp = max(8, (tp // 8) * 8)             # keep sublane (8) granularity
    grid = (pl.cdiv(rows_p, tp),)              # ragged last block is masked

    itemsize = 4
    kernel = _make_kernel(pack, out_dim)

    out_packed = pl.pallas_call(
        kernel,
        out_shape=jax.ShapeDtypeStruct((rows_p, pack * out_dim), out_dtype),
        grid_spec=pltpu.PrefetchScalarGridSpec(
            num_scalar_prefetch=0,
            grid=grid,
            in_specs=[
                pl.BlockSpec((tp, pack * d), lambda i: (i, 0)),            # x tiles stream
                pl.BlockSpec((pack * d, pack * out_dim), lambda i: (0, 0)),  # weight resident
                pl.BlockSpec((1, pack * out_dim), lambda i: (0, 0)),         # bias resident
            ],
            out_specs=pl.BlockSpec((tp, pack * out_dim), lambda i: (i, 0)),
        ),
        compiler_params=pltpu.CompilerParams(
            # TODO(synk): on v7x, verify both TensorCores get rows; if one is
            # idle in the profile, switch this axis to pltpu.CORE_PARALLEL.
            dimension_semantics=("parallel",),
            vmem_limit_bytes=32 * 1024 * 1024,
        ),
        cost_estimate=pl.CostEstimate(
            flops=2 * rows_p * (pack * d) * (pack * out_dim)
            + 5 * n_pad * out_dim,
            transcendentals=n_pad * out_dim,
            bytes_accessed=(n_pad * d + n_pad * out_dim
                            + (pack * d) * (pack * out_dim) + pack * out_dim)
            * itemsize,
        ),
    )(xp, w_blk, fb_tiled)

    out = out_packed.reshape(n_pad, out_dim)   # free row-major reshape
    if n_pad != n:
        out = out[:n]
    return out


def f_nodes_reference(x, h_v, w, b):
    """Pure-JAX reference mirroring the PyTorch forward."""
    n = x.shape[0]
    hvb = jnp.broadcast_to(h_v, (n, h_v.shape[0]))
    cat = jnp.concatenate([x, hvb], axis=1)
    s = cat @ w.T + b
    return jax.nn.softmax(s, axis=1)


if __name__ == "__main__":
    node_embedding_dim = 16   # D
    n_nodes = 203             # N: not a multiple of 8 -> exercises row padding
    out_dim = 20

    key = jax.random.PRNGKey(0)
    k_x, k_h, k_w, k_b = jax.random.split(key, 4)

    x = jax.random.normal(k_x, (n_nodes, node_embedding_dim), dtype=jnp.float32)
    h_v = jax.random.normal(k_h, (node_embedding_dim,), dtype=jnp.float32)

    # Deterministic Linear(2D, 20) parameters (PyTorch weight layout: (out, in)).
    bound = 1.0 / jnp.sqrt(2.0 * node_embedding_dim)
    w = jax.random.uniform(k_w, (out_dim, 2 * node_embedding_dim),
                           minval=-bound, maxval=bound, dtype=jnp.float32)
    b = jax.random.uniform(k_b, (out_dim,),
                           minval=-bound, maxval=bound, dtype=jnp.float32)

    # Small tile (64 rows = 8 packed rows) so the test exercises a multi-step
    # grid with a ragged last block: 203 -> 208 rows -> 26 packed rows -> 4
    # grid steps.  Production default is tile_n=32768.
    out = f_nodes_forward(x, h_v, w, b, tile_n=64)
    jax.block_until_ready(out)

    ref = f_nodes_reference(x, h_v, w, b)
    assert out.shape == (n_nodes, out_dim)
    assert jnp.allclose(out, ref, atol=1e-4, rtol=1e-4), "mismatch vs reference"
    assert jnp.allclose(jnp.sum(out, axis=1), 1.0, atol=1e-4), \
        "softmax rows must sum to 1"

    print("KERNEL_OK")
</pallas_src>

<mosaic_0001>
module attributes {stable_mosaic.version = 11 : i64} {
  func.func @kernel(%arg0: i32, %arg1: memref<8x128xf32, #tpu.memory_space<vmem>>, %arg2: memref<128x160xf32, #tpu.memory_space<vmem>>, %arg3: memref<1x160xf32, #tpu.memory_space<vmem>>, %arg4: memref<8x160xf32, #tpu.memory_space<vmem>>) attributes {dimension_semantics = [#tpu.dimension_semantics<parallel>], iteration_bounds = array<i64: 4>, scalar_prefetch = 0 : i64, scratch_operands = 0 : i64, tpu.core_type = #tpu.core_type<tc>, window_params = [{transform_indices = @transform_0, window_bounds = array<i64: 8, 128>}, {pipeline_mode = #tpu.pipeline_mode<synchronous>, transform_indices = @transform_1, window_bounds = array<i64: 128, 160>}, {pipeline_mode = #tpu.pipeline_mode<synchronous>, transform_indices = @transform_2, window_bounds = array<i64: 1, 160>}, {transform_indices = @transform_3, window_bounds = array<i64: 8, 160>}]} {
    %c0 = arith.constant 0 : index
    %c0_0 = arith.constant 0 : index
    %0 = vector.load %arg1[%c0, %c0_0] : memref<8x128xf32, #tpu.memory_space<vmem>>, vector<8x128xf32>
    %c0_1 = arith.constant 0 : index
    %c0_2 = arith.constant 0 : index
    %1 = vector.load %arg2[%c0_1, %c0_2] : memref<128x160xf32, #tpu.memory_space<vmem>>, vector<128x160xf32>
    %cst = arith.constant dense<0.000000e+00> : vector<8x160xf32>
    %2 = tpu.matmul %0, %1, %cst {dimension_numbers = #tpu.dot_dimension_numbers<[1], [0], [0], [1], [0, 0, 1, 1], [], []>} : vector<8x128xf32>, vector<128x160xf32>, vector<8x160xf32> -> vector<8x160xf32>
    %c0_3 = arith.constant 0 : index
    %c0_4 = arith.constant 0 : index
    %3 = vector.load %arg3[%c0_3, %c0_4] : memref<1x160xf32, #tpu.memory_space<vmem>>, vector<1x160xf32>
    %4 = vector.broadcast %3 : vector<1x160xf32> to vector<8x160xf32>
    %5 = arith.addf %2, %4 : vector<8x160xf32>
    %6 = vector.shape_cast %5 : vector<8x160xf32> to vector<8x8x20xf32>
    %cst_5 = arith.constant dense<0xFF800000> : vector<8x8xf32>
    %7 = vector.multi_reduction <maximumf>, %6, %cst_5 [2] : vector<8x8x20xf32> to vector<8x8xf32>
    %8 = vector.shape_cast %7 : vector<8x8xf32> to vector<8x8x1xf32>
    %9 = vector.broadcast %8 : vector<8x8x1xf32> to vector<8x8x20xf32>
    %10 = arith.subf %6, %9 : vector<8x8x20xf32>
    %11 = math.exp %10 : vector<8x8x20xf32>
    %cst_6 = arith.constant dense<0.000000e+00> : vector<8x8xf32>
    %12 = vector.multi_reduction <add>, %11, %cst_6 [2] : vector<8x8x20xf32> to vector<8x8xf32>
    %13 = vector.shape_cast %12 : vector<8x8xf32> to vector<8x8x1xf32>
    %14 = vector.broadcast %13 : vector<8x8x1xf32> to vector<8x8x20xf32>
    %15 = arith.divf %11, %14 : vector<8x8x20xf32>
    %16 = vector.shape_cast %15 : vector<8x8x20xf32> to vector<8x160xf32>
    %c0_7 = arith.constant 0 : index
    %c0_8 = arith.constant 0 : index
    %17 = vector.load %arg4[%c0_7, %c0_8] : memref<8x160xf32, #tpu.memory_space<vmem>>, vector<8x160xf32>
    tpu.vector_store %arg4[%c0_7, %c0_8], %16 {strides = array<i32>} : memref<8x160xf32, #tpu.memory_space<vmem>>, vector<8x160xf32>,
    return
  }
  func.func @transform_0(%arg0: i32) -> (i32, i32) {
    %c0_i32 = arith.constant 0 : i32
    %c0_i32_0 = arith.constant 0 : i32
    return %arg0, %c0_i32 : i32, i32
  }
  func.func @transform_1(%arg0: i32) -> (i32, i32) {
    %c0_i32 = arith.constant 0 : i32
    %c0_i32_0 = arith.constant 0 : i32
    %c0_i32_1 = arith.constant 0 : i32
    return %c0_i32, %c0_i32_0 : i32, i32
  }
  func.func @transform_2(%arg0: i32) -> (i32, i32) {
    %c0_i32 = arith.constant 0 : i32
    %c0_i32_0 = arith.constant 0 : i32
    %c0_i32_1 = arith.constant 0 : i32
    return %c0_i32, %c0_i32_0 : i32, i32
  }
  func.func @transform_3(%arg0: i32) -> (i32, i32) {
    %c0_i32 = arith.constant 0 : i32
    %c0_i32_0 = arith.constant 0 : i32
    return %arg0, %c0_i32 : i32, i32
  }
}

</mosaic_0001>

<bundles_post_ra>
// kernel: tpu_custom_call.1
= control target key start
LH: loop header
LB: loop body
LE: loop exit
PB: predicated region body
PF: predicated region fallthrough
CT: control target
= control target key end

     0   :  { %8 = vsyncpa [#allocation3], 0  ;;  %s1239_s0 = inlined_call_operand.vmem [shape: f32[26,128], index: 0, kind: input, shape index: {}]   ;;  %s1240_s1 = inlined_call_operand.vmem [shape: f32[128,160], index: 1, kind: input, shape index: {}]   ;;  %s1241_s2 = inlined_call_operand.vmem [shape: f32[1,160], index: 2, kind: input, shape index: {}]   ;;  %s1242_s3 = inlined_call_operand.hbm [shape: f32[26,160], index: 3, kind: output, shape index: {}]  }
   0x1   :  { %10 = vsyncpa [#allocation3 + $0x1], 0  ;;  %s988_s12 = smov 0   ;;  %s990_s13 = smov 0  }
   0x2   :  { %s992_s14 = smov 0   ;;  %s994_s15 = smov 0  }
   0x3 LB: > { %s1009_s16 = sadd.s32 4294967295, %s948_s15   ;;  %s788_s17 = sadd.s32 4294967294, %s948_s15   ;;  %s948_s15 = sphi %s994_s15, %s1248_s15   ;;  %s944_s14 = sphi %s992_s14, %s1247_s14   ;;  %s940_s13 = sphi %s990_s13, %s1246_s13   ;;  %s936_s12 = sphi %s988_s12, %s1245_s12  }
   0x4   : > { %s1013_s18 = sadd.s32 1, %s948_s15   ;;  %s91_s19 = sadd.s32 1, %s944_s14 }
   0x5   : > { %s88_s20 = ssub.s32 %s948_s15, %s1013_s18  ;;  %p101_p0 = scmp.ne.s32.totalorder %s944_s14, %s940_s13 }
   0x6   : > { %p89_p1 = scmp.eq.s32.totalorder %s88_s20, 0  ;;  %p102_p2 = scmp.eq.s32.totalorder %s1009_s16, 3 }
   0x7   : > { %p107_p3 = scmp.ne.s32.totalorder %s940_s13, %s936_s12  ;;  %p108_p4 = scmp.eq.s32.totalorder %s788_s17, 3 }
   0x8   : > { %s1024_s21 = scalar_select %p89_p1, %s944_s14, %s91_s19  }
   0x9   : > { %p1026_p5 = por %p102_p2, %p101_p0  ;;  %p1030_p6 = por %p108_p4, %p107_p3 }
   0xa   : > { %p791_p7 = scmp.ge.s32.totalorder %s948_s15, 1  ;;  %p139_p8 = scmp.lt.s32.totalorder %s948_s15, 5 }
   0xc   : > { %p140_p9 = pnand %p791_p7, %p139_p8 }
   0xd   : > { %p162_p10 = scmp.lt.s32.totalorder (!%p140_p9), %s1009_s16, 3  ;;  %s951_s20 = smov (!%p140_p9), 108  }
   0xe   : > { %143 = sbr.rel (%p140_p9) target bundleno = 863 (0x35f), region = 32  ;;  %s952_s24 = smov (!%p140_p9), 8  }
   0xf   : > { %s954_s26 = smov (!%p140_p9), 68   ;;  %s955_s27 = smov (!%p140_p9), 48  }
  0x10   : > { %s956_s28 = smov (!%p140_p9), 116   ;;  %s957_s29 = smov (!%p140_p9), 28  }
  0x11   : > { %s960_s30 = smov (!%p140_p9), 40   ;;  %s961_s4 = smov (!%p140_p9), 20  }
  0x12   : > { %s962_s5 = smov (!%p140_p9), 100   ;;  %s963_s6 = smov (!%p140_p9), 60  }
  0x13   : > { %v198_v0 = vld [vmem:[%s1240_s1 + $0xf8] sm:$0xff]  ;;  %v197_v1 = vld [vmem:[%s1240_s1 + $0xf0] sm:$0xff]  ;;  %v196_v2 = vld [vmem:[%s1240_s1 + $0xe8] sm:$0xff]  ;;  %v950_v4 = vmov 0.0   ;;  %s163_s7 = scalar_select %p162_p10, %s1009_s16, 3  ;;  %v201_v34 = vlaneseq  ;;  %vm303_vm0 = vcmask 64512  }
  0x14   : > { %211 = vmatprep.subr.mxu0 %v198_v0  ;;  %v195_v3 = vld [vmem:[%s1240_s1 + $0xe0] sm:$0xff]  ;;  %275 = vmatprep.mubr.f32.mxu0 %v950_v4  ;;  %v194_v5 = vld [vmem:[%s1240_s1 + $0xd8] sm:$0xff]  ;;  %v193_v6 = vld [vmem:[%s1240_s1 + $0xd0] sm:$0xff]  ;;  %v958_v45 = vmov 1983009808   ;;  %vm445_vm1 = vcmask 162816  }
  0x15   : > { %212 = vmatpush1.msra.mxu0 %v197_v1  ;;  %v192_v7 = vld [vmem:[%s1240_s1 + $0xc8] sm:$0xff]  ;;  %v191_v8 = vld [vmem:[%s1240_s1 + $0xc0] sm:$0xff]  ;;  %v190_v9 = vld [vmem:[%s1240_s1 + $0xb8] sm:$0xff]  ;;  %s793_s25 = sshll.u32 %s163_s7, 3  ;;  %v202_v35 = vshrl.u32 %v201_v34, 7  ;;  %v312_v46 = vunpack.c.l.s4 %v958_v45  ;;  %s965_s7 = smov 80  }
  0x16   : > { %213 = vmatprep.subr.mxu0 %v196_v2  ;;  %v189_v10 = vld [vmem:[%s1240_s1 + $0xb0] sm:$0xff]  ;;  %v188_v11 = vld [vmem:[%s1240_s1 + $0xa8] sm:$0xff]  ;;  %v187_v12 = vld [vmem:[%s1240_s1 + $0xa0] sm:$0xff]  ;;  %s165_s8 = scalar_lea.vmem %s1239_s0, %s793_s25  ;;  %s953_s25 = smov 88   ;;  %v959_v53 = vmov 1934713408  }
  0x17   : > { %214 = vmatpush1.msra.mxu0 %v195_v3  ;;  %v186_v13 = vld [vmem:[%s1240_s1 + $0x98] sm:$0xff]  ;;  %v185_v14 = vld [vmem:[%s1240_s1 + $0x90] sm:$0xff]  ;;  %v184_v15 = vld [vmem:[%s1240_s1 + $0x88] sm:$0xff]  ;;  %v203_v36 = vsub.s32 0, %v202_v35  ;;  %v207_v41 = vsub.s32 1, %v202_v35  ;;  %v313_v49 = vunpack.c.0.s8 %v312_v46  ;;  %v376_v54 = vunpack.c.l.s4 %v959_v53  ;;  %s966_s9 = smov 120  }
  0x18   : > { %215 = vmatprep.subr.mxu0 %v194_v5  ;;  %v183_v16 = vld [vmem:[%s1240_s1 + $0x80] sm:$0xff]  ;;  %v182_v17 = vld [vmem:[%s1240_s1 + $0x78] sm:$0xff]  ;;  %v181_v18 = vld [vmem:[%s1240_s1 + $0x70] sm:$0xff]  ;;  %s159_s10 = sand.u32 1, %s940_s13   ;;  %vm699_vm2 = vcmask 326656   ;;  %vm701_vm3 = vcmask 490496  }
  0x19   : > { %216 = vmatpush1.msra.mxu0 %v193_v6  ;;  %v180_v19 = vld [vmem:[%s1240_s1 + $0x68] sm:$0xff]  ;;  %v179_v20 = vld [vmem:[%s1240_s1 + $0x60] sm:$0xff]  ;;  %v178_v21 = vld [vmem:[%s1240_s1 + $0x58] sm:$0xff]  ;;  %v1140_v52 = vsub.s32 %v313_v49, %v202_v35  ;;  %v377_v61 = vunpack.c.0.s8 %v376_v54  ;;  %s792_s11 = sshll.u32 %s159_s10, 4  ;;  %vm703_vm4 = vcmask 654336   ;;  %vm705_vm5 = vcmask 818176  }
  0x1a   : > { %217 = vmatprep.subr.mxu0 %v192_v7  ;;  %v177_v22 = vld [vmem:[%s1240_s1 + $0x50] sm:$0xff]  ;;  %v176_v23 = vld [vmem:[%s1240_s1 + $0x48] sm:$0xff]  ;;  %v175_v24 = vld [vmem:[%s1240_s1 + $0x40] sm:$0xff]  ;;  %s799_s17 = sshll.u32 %s1009_s16, 8  ;;  %s161_s19 = scalar_lea.vmem [#allocation2], %s792_s11  ;;  %vm707_vm6 = vcmask 982016  }
  0x1b   : > { %218 = vmatpush1.msra.mxu0 %v191_v8  ;;  %v174_v25 = vld [vmem:[%s1240_s1 + $0x38] sm:$0xff]  ;;  %v173_v26 = vld [vmem:[%s1240_s1 + $0x30] sm:$0xff]  ;;  %v172_v27 = vld [vmem:[%s1240_s1 + $0x28] sm:$0xff]  ;;  %vm709_vm7 = vcmask 97280   ;;  %vm712_vm8 = vcmask 261120   ;;  %s715_s16 = scalar_lea.sflag [#allocation3], %s159_s10 }
  0x1c   : > { %219 = vmatprep.subr.mxu0 %v190_v9  ;;  %v171_v28 = vld [vmem:[%s1240_s1 + $0x20] sm:$0xff]  ;;  %v170_v29 = vld [vmem:[%s1240_s1 + $0x18] sm:$0xff]  ;;  %v169_v30 = vld [vmem:[%s1240_s1 + $0x10] sm:$0xff]  ;;  %v1146_v9 = vsub.s32 %v377_v61, %v202_v35 }
  0x1d   : > { %220 = vmatpush1.msra.mxu0 %v189_v10  ;;  %v168_v31 = vld [vmem:[%s1240_s1 + $0x8] sm:$0xff]  ;;  %v167_v32 = vld [vmem:[%s1240_s1] sm:$0xff] }
  0x1e   : > { %221 = vmatprep.subr.mxu0 %v188_v11  ;;  %v166_v33 = vld [vmem:[%s165_s8] sm:$0xff]  ;;  %s964_s8 = smov 12  }
  0x1f   : > { %222 = vmatpush1.msra.mxu0 %v187_v12  ;;  %v199_v37 = vld [vmem:[%s1241_s2] sm:$0x3] }
  0x20   : > { %223 = vmatprep.subr.mxu0 %v186_v13  ;;  %v204_v38 = vrot.slane %v199_v37, %v203_v36  ;;  %v208_v42 = vrot.slane %v199_v37, %v207_v41 }
  0x21   : > { %224 = vmatpush1.msra.mxu0 %v185_v14 }
  0x22   : > { %225 = vmatprep.subr.mxu0 %v184_v15 }
  0x23   : > { %226 = vmatpush1.msra.mxu0 %v183_v16 }
  0x24   : > { %227 = vmatprep.subr.mxu0 %v182_v17 }
  0x25   : > { %228 = vmatpush1.msra.mxu0 %v181_v18 }
  0x26   : > { %229 = vmatprep.subr.mxu0 %v180_v19 }
  0x27   : > { %230 = vmatpush1.msra.mxu0 %v179_v20 }
  0x28   : > { %231 = vmatprep.subr.mxu0 %v178_v21 }
  0x29   : > { %232 = vmatpush1.msra.mxu0 %v177_v22 }
  0x2a   : > { %233 = vmatprep.subr.mxu0 %v176_v23 }
  0x2b   : > { %234 = vmatpush1.msra.mxu0 %v175_v24 }
  0x2c   : > { %235 = vmatprep.subr.mxu0 %v174_v25 }
  0x2d   : > { %236 = vmatpush1.msra.mxu0 %v173_v26 }
  0x2e   : > { %237 = vmatprep.subr.mxu0 %v172_v27 }
  0x2f   : > { %238 = vmatpush1.msra.mxu0 %v171_v28 }
  0x30   : > { %239 = vmatprep.subr.mxu0 %v170_v29 }
  0x31   : > { %240 = vmatpush1.msra.mxu0 %v169_v30 }
  0x32   : > { %241 = vmatprep.subr.mxu0 %v168_v31 }
  0x33   : > { %242 = vmatpush1.msra.mxu0 %v167_v32 }
  0x34   : > { %276 = vmatmul.mubr.f32.vlgmr.msra.gmra.mxu0 %v166_v33 }
  0xf4   : > { %v277_v39 = vpop.f32.mrf.mxu0 }
  0xf5   : > { %v278_v40 = vadd.f32 %v277_v39, %v204_v38 }
  0xf6   : > { %v279_v43 = vpop.f32.mrf.mxu0 }
  0xf7   : > { %283 = vrot.lane.b32.xlu1 %v278_v40, %s951_s20  ;;  %299 = vrot.lane.b32.xlu0 %v278_v40, %s952_s24  ;;  %v280_v44 = vadd.f32 %v279_v43, %v208_v42  ;;  %s729_s20 = sshll.u32 %s161_s19, 4  ;;  %s1200_s20 = int_to_ptr.vmem [resolvable:$true] %s729_s20 }
  0xfb   : > { %286 = vrot.lane.b32.xlu1 %v278_v40, %s953_s25  ;;  %289 = vrot.lane.b32.xlu0 %v278_v40, %s954_s26  ;;  %s1198_s26 = scalar_lea.hbm %s1242_s3, %s799_s17 }
  0xff   : > { %292 = vrot.lane.b32.xlu1 %v278_v40, %s955_s27  ;;  %301 = vrot.lane.b32.xlu0 %v280_v44, %s952_s24  ;;  %s888_s27 = scalar_lea.vmem %s1200_s20, 256 }
 0x100   : > { %p889_p11 = scmp.ne.s32.totalorder %s1200_s20, %s888_s27 }
 0x102   : > { %p890_p12 = pnand %p889_p11, %p1026_p5 }
 0x103   : > { %306 = vrot.lane.b32.xlu1 %v280_v44, %s956_s28  ;;  %295 = vrot.lane.b32.xlu0 %v278_v40, %s957_s29  ;;  %s967_s28 = smov [#allocation2]  }
 0x104   : > { %p891_p13 = pneg %p890_p12  ;;  %s892_s29 = sshll.u32 %s967_s28, 4  ;;  %s893_s29 = int_to_ptr.vmem [resolvable:$false] %s892_s29 }
 0x105   : > { %p895_p0 = scmp.lt.s32.totalorder %s1200_s20, %s893_s29 }
 0x169   : > { %v284_v47 = vpop.permute.xlu1 %283  ;;  %v300_v48 = vpop.permute.xlu0 %299 }
 0x16d   : > { %v287_v50 = vpop.permute.xlu1 %286  ;;  %v290_v51 = vpop.permute.xlu0 %289 }
 0x16e   : > { %v309_v55 = vcombine.low %v278_v40, %v287_v50  ;;  %v325_v56 = vcombine.low %v284_v47, %v290_v51  ;;  %v310_v59 = vcombine.high %v278_v40, %v287_v50  ;;  %v326_v60 = vcombine.high %v284_v47, %v290_v51 }
 0x170   : > { %v317_v62 = vrot.slane %v309_v55, %v1140_v52  ;;  %v333_v63 = vrot.slane %v325_v56, %v1140_v52  ;;  %v324_v5 = vrot.slane %v310_v59, %v1140_v52  ;;  %v340_v6 = vrot.slane %v326_v60, %v1140_v52 }
 0x171   : > { %v293_v57 = vpop.permute.xlu1 %292  ;;  %v302_v58 = vpop.permute.xlu0 %301 }
 0x172   : > { %v304_v0 = vsel %vm303_vm0, %v300_v48, %v302_v58  ;;  %v373_v10 = vcombine.low %v317_v62, %v333_v63  ;;  %v374_v15 = vcombine.high %v317_v62, %v333_v63  ;;  %v389_v16 = vcombine.low %v324_v5, %v340_v6 }
 0x173   : > { %v341_v1 = vcombine.low %v293_v57, %v304_v0  ;;  %v342_v2 = vcombine.high %v293_v57, %v304_v0  ;;  %v390_v25 = vcombine.high %v324_v5, %v340_v6 }
 0x174   : > { %v381_v21 = vrot.slane %v373_v10, %v1146_v9  ;;  %v397_v28 = vrot.slane %v389_v16, %v1146_v9  ;;  %v388_v29 = vrot.slane %v374_v15, %v1146_v9 }
 0x175   : > { %v307_v3 = vpop.permute.xlu1 %306  ;;  %v296_v4 = vpop.permute.xlu0 %295  ;;  %v349_v11 = vrot.slane %v341_v1, %v1140_v52  ;;  %v356_v12 = vrot.slane %v342_v2, %v1140_v52  ;;  %v404_v35 = vrot.slane %v390_v25, %v1146_v9 }
 0x176   : > { %v357_v7 = vcombine.low %v296_v4, %v307_v3  ;;  %v358_v8 = vcombine.high %v296_v4, %v307_v3 }
 0x178   : > { %v365_v13 = vrot.slane %v357_v7, %v1140_v52  ;;  %v372_v14 = vrot.slane %v358_v8, %v1140_v52 }
 0x17a   : > { %v405_v17 = vcombine.low %v349_v11, %v365_v13  ;;  %v406_v18 = vcombine.high %v349_v11, %v365_v13  ;;  %v421_v19 = vcombine.low %v356_v12, %v372_v14  ;;  %v422_v20 = vcombine.high %v356_v12, %v372_v14 }
 0x17c   : > { %v413_v22 = vrot.slane %v405_v17, %v1146_v9  ;;  %v429_v23 = vrot.slane %v421_v19, %v1146_v9  ;;  %v420_v24 = vrot.slane %v406_v18, %v1146_v9  ;;  %v436_v30 = vrot.slane %v422_v20, %v1146_v9 }
 0x17e   : > { %v438_v26 = vcombine.high %v381_v21, %v413_v22  ;;  %v437_v27 = vcombine.low %v381_v21, %v413_v22  ;;  %v441_v33 = vcombine.low %v397_v28, %v429_v23  ;;  %v439_v34 = vcombine.low %v388_v29, %v420_v24 }
 0x17f   : > { %v443_v38 = vcombine.low %v404_v35, %v436_v30  ;;  %v440_v39 = vcombine.high %v388_v29, %v420_v24  ;;  %v442_v42 = vcombine.high %v397_v28, %v429_v23  ;;  %v444_v44 = vcombine.high %v404_v35, %v436_v30 }
 0x180   : > { %v449_v31 = vsel %vm445_vm1, %v438_v26, -inf  ;;  %v446_v32 = vsel %vm445_vm1, %v437_v27, -inf  ;;  %v458_v36 = vsel %vm445_vm1, %v441_v33, -inf  ;;  %v452_v37 = vsel %vm445_vm1, %v439_v34, -inf }
 0x181   : > { %450 = vmax.xlane.f32.xlu1 %v449_v31  ;;  %447 = vmax.xlane.f32.xlu0 %v446_v32  ;;  %v464_v40 = vsel %vm445_vm1, %v443_v38, -inf  ;;  %v455_v41 = vsel %vm445_vm1, %v440_v39, -inf  ;;  %v461_v43 = vsel %vm445_vm1, %v442_v42, -inf  ;;  %v467_v45 = vsel %vm445_vm1, %v444_v44, -inf }
 0x185   : > { %459 = vmax.xlane.f32.xlu1 %v458_v36  ;;  %453 = vmax.xlane.f32.xlu0 %v452_v37 }
 0x189   : > { %465 = vmax.xlane.f32.xlu1 %v464_v40  ;;  %456 = vmax.xlane.f32.xlu0 %v455_v41 }
 0x18d   : > { %462 = vmax.xlane.f32.xlu0 %v461_v43 }
 0x191   : > { %468 = vmax.xlane.f32.xlu0 %v467_v45 }
 0x20a   : > { %v451_v46 = vpop.xlane.xlu1 %450  ;;  %v448_v47 = vpop.xlane.xlu0 %447 }
 0x20b   : > { %v471_v48 = vsub.f32 %v438_v26, %v451_v46  ;;  %v470_v49 = vsub.f32 %v437_v27, %v448_v47 }
 0x20d   : > { %v480_v50 = vmul.f32 1.442695, %v471_v48  ;;  %v478_v51 = vmul.f32 1.442695, %v470_v49 }
 0x20e   : > { %v460_v53 = vpop.xlane.xlu1 %459  ;;  %v454_v54 = vpop.xlane.xlu0 %453 }
 0x20f   : > { %856 = vpow2.f32 %v480_v50  ;;  %v474_v55 = vsub.f32 %v441_v33, %v460_v53  ;;  %v472_v56 = vsub.f32 %v439_v34, %v454_v54 }
 0x210   : > { %858 = vpow2.f32 %v478_v51 }
 0x211   : > { %v482_v57 = vmul.f32 1.442695, %v472_v56  ;;  %v486_v58 = vmul.f32 1.442695, %v474_v55 }
 0x212   : > { %v466_v59 = vpop.xlane.xlu1 %465  ;;  %v457_v60 = vpop.xlane.xlu0 %456 }
 0x213   : > { %v476_v61 = vsub.f32 %v443_v38, %v466_v59  ;;  %v473_v62 = vsub.f32 %v440_v39, %v457_v60  ;;  %860 = vpow2.f32 %v482_v57 }
 0x214   : > { %862 = vpow2.f32 %v486_v58 }
 0x215   : > { %v484_v63 = vmul.f32 1.442695, %v473_v62  ;;  %v490_v0 = vmul.f32 1.442695, %v476_v61 }
 0x216   : > { %v463_v1 = vpop.xlane.xlu0 %462 }
 0x217   : > { %v475_v2 = vsub.f32 %v442_v42, %v463_v1  ;;  %864 = vpow2.f32 %v484_v63 }
 0x218   : > { %866 = vpow2.f32 %v490_v0 }
 0x219   : > { %v488_v3 = vmul.f32 1.442695, %v475_v2 }
 0x21a   : > { %v469_v4 = vpop.xlane.xlu0 %468 }
 0x21b   : > { %868 = vpow2.f32 %v488_v3  ;;  %v477_v5 = vsub.f32 %v444_v44, %v469_v4 }
 0x21c   : > { %v857_v6 = vpop.eup %856 }
 0x21d   : > { %v859_v7 = vpop.eup %858  ;;  %v492_v8 = vmul.f32 1.442695, %v477_v5  ;;  %v497_v10 = vsel %vm445_vm1, %v857_v6, 0.0 }
 0x21e   : > { %498 = vadd.xlane.f32.xlu0 %v497_v10  ;;  %v494_v11 = vsel %vm445_vm1, %v859_v7, 0.0 }
 0x21f   : > { %870 = vpow2.f32 %v492_v8  ;;  %495 = vadd.xlane.f32.xlu1 %v494_v11 }
 0x220   : > { %v861_v12 = vpop.eup %860 }
 0x221   : > { %v500_v13 = vsel %vm445_vm1, %v861_v12, 0.0  ;;  %v863_v14 = vpop.eup %862 }
 0x222   : > { %v506_v16 = vsel %vm445_vm1, %v863_v14, 0.0 }
 0x223   : > { %501 = vadd.xlane.f32.xlu1 %v500_v13 }
 0x224   : > { %v865_v15 = vpop.eup %864 }
 0x225   : > { %v503_v17 = vsel %vm445_vm1, %v865_v15, 0.0  ;;  %v867_v18 = vpop.eup %866 }
 0x226   : > { %504 = vadd.xlane.f32.xlu0 %v503_v17  ;;  %v512_v21 = vsel %vm445_vm1, %v867_v18, 0.0 }
 0x227   : > { %507 = vadd.xlane.f32.xlu1 %v506_v16 }
 0x228   : > { %v869_v19 = vpop.eup %868 }
 0x229   : > { %v509_v20 = vsel %vm445_vm1, %v869_v19, 0.0 }
 0x22a   : > { %510 = vadd.xlane.f32.xlu0 %v509_v20 }
 0x22b   : > { %513 = vadd.xlane.f32.xlu1 %v512_v21 }
 0x22c   : > { %v871_v22 = vpop.eup %870 }
 0x22d   : > { %v515_v23 = vsel %vm445_vm1, %v871_v22, 0.0 }
 0x22e   : > { %516 = vadd.xlane.f32.xlu0 %v515_v23 }
 0x2a7   : > { %v499_v25 = vpop.xlane.xlu0 %498 }
 0x2a8   : > { %v496_v24 = vpop.xlane.xlu1 %495  ;;  %872 = vrcp.f32 %v499_v25 }
 0x2ac   : > { %v502_v26 = vpop.xlane.xlu1 %501 }
 0x2ad   : > { %874 = vrcp.f32 %v502_v26 }
 0x2ae   : > { %876 = vrcp.f32 %v496_v24 }
 0x2af   : > { %v505_v28 = vpop.xlane.xlu0 %504 }
 0x2b0   : > { %v508_v27 = vpop.xlane.xlu1 %507  ;;  %878 = vrcp.f32 %v505_v28 }
 0x2b1   : > { %880 = vrcp.f32 %v508_v27 }
 0x2b3   : > { %v511_v30 = vpop.xlane.xlu0 %510 }
 0x2b4   : > { %v514_v29 = vpop.xlane.xlu1 %513 }
 0x2b5   : > { %882 = vrcp.f32 %v514_v29  ;;  %v873_v32 = vpop.eup %872 }
 0x2b6   : > { %884 = vrcp.f32 %v511_v30  ;;  %v521_v36 = vmul.f32 %v873_v32, %v857_v6 }
 0x2b7   : > { %v517_v31 = vpop.xlane.xlu0 %516 }
 0x2b8   : > { %886 = vrcp.f32 %v517_v31 }
 0x2ba   : > { %v875_v33 = vpop.eup %874 }
 0x2bb   : > { %v877_v34 = vpop.eup %876  ;;  %v523_v37 = vmul.f32 %v875_v33, %v861_v12 }
 0x2bc   : > { %v519_v41 = vmul.f32 %v877_v34, %v859_v7 }
 0x2bd   : > { %v879_v35 = vpop.eup %878 }
 0x2be   : > { %v525_v38 = vmul.f32 %v879_v35, %v865_v15  ;;  %v881_v39 = vpop.eup %880  ;;  %v534_v45 = vcombine.low %v519_v41, %v523_v37  ;;  %v535_v56 = vcombine.high %v519_v41, %v523_v37 }
 0x2bf   : > { %v527_v46 = vmul.f32 %v881_v39, %v863_v14 }
 0x2c0   : > { %v550_v42 = vcombine.low %v521_v36, %v525_v38  ;;  %v551_v49 = vcombine.high %v521_v36, %v525_v38  ;;  %v542_v55 = vrot.slane %v534_v45, %v1140_v52  ;;  %v549_v2 = vrot.slane %v535_v56, %v1140_v52 }
 0x2c2   : > { %v883_v40 = vpop.eup %882  ;;  %v558_v48 = vrot.slane %v550_v42, %v1140_v52  ;;  %v565_v61 = vrot.slane %v551_v49, %v1140_v52 }
 0x2c3   : > { %v531_v43 = vmul.f32 %v883_v40, %v867_v18  ;;  %v885_v44 = vpop.eup %884 }
 0x2c4   : > { %v529_v50 = vmul.f32 %v885_v44, %v869_v19  ;;  %v599_v59 = vcombine.high %v542_v55, %v558_v48  ;;  %v598_v60 = vcombine.low %v542_v55, %v558_v48  ;;  %v614_v6 = vcombine.low %v549_v2, %v565_v61 }
 0x2c5   : > { %v887_v47 = vpop.eup %886  ;;  %v566_v53 = vcombine.low %v527_v46, %v531_v43  ;;  %v567_v54 = vcombine.high %v527_v46, %v531_v43  ;;  %v615_v17 = vcombine.high %v549_v2, %v565_v61 }
 0x2c6   : > { %v533_v51 = vmul.f32 %v887_v47, %v871_v22  ;;  %v613_v7 = vrot.slane %v599_v59, %v1146_v9  ;;  %v606_v10 = vrot.slane %v598_v60, %v1146_v9 }
 0x2c7   : > { %v574_v62 = vrot.slane %v566_v53, %v1140_v52  ;;  %v581_v0 = vrot.slane %v567_v54, %v1140_v52  ;;  %v629_v21 = vrot.slane %v615_v17, %v1146_v9 }
 0x2c8   : > { %v582_v57 = vcombine.low %v529_v50, %v533_v51  ;;  %v583_v58 = vcombine.high %v529_v50, %v533_v51 }
 0x2ca   : > { %v590_v63 = vrot.slane %v582_v57, %v1140_v52  ;;  %v597_v1 = vrot.slane %v583_v58, %v1140_v52  ;;  %v622_v52 = vrot.slane %v614_v6, %v1146_v9 }
 0x2cc   : > { %v631_v3 = vcombine.high %v574_v62, %v590_v63  ;;  %v630_v4 = vcombine.low %v574_v62, %v590_v63  ;;  %v646_v5 = vcombine.low %v581_v0, %v597_v1  ;;  %v647_v15 = vcombine.high %v581_v0, %v597_v1 }
 0x2ce   : > { %v645_v8 = vrot.slane %v631_v3, %v1146_v9  ;;  %v638_v11 = vrot.slane %v630_v4, %v1146_v9  ;;  %v654_v14 = vrot.slane %v646_v5, %v1146_v9  ;;  %v661_v20 = vrot.slane %v647_v15, %v1146_v9 }
 0x2d0   : > { %v664_v12 = vcombine.low %v613_v7, %v645_v8  ;;  %v663_v13 = vcombine.high %v606_v10, %v638_v11  ;;  %v662_v16 = vcombine.low %v606_v10, %v638_v11  ;;  %v667_v18 = vcombine.high %v622_v52, %v654_v14 }
 0x2d1   : > { %v665_v19 = vcombine.high %v613_v7, %v645_v8  ;;  %v669_v22 = vcombine.high %v629_v21, %v661_v20  ;;  %v666_v23 = vcombine.low %v622_v52, %v654_v14  ;;  %v668_v24 = vcombine.low %v629_v21, %v661_v20 }
 0x2d2   : > { %675 = vrot.lane.b32.xlu0 %v664_v12, %s960_s30  ;;  %671 = vrot.lane.b32.xlu1 %v663_v13, %s961_s4  ;;  %s894_s30 = scalar_lea.vmem %s893_s29, 512 }
 0x2d3   : > { %p896_p1 = scmp.lt.s32.totalorder %s894_s30, %s888_s27 }
 0x2d5   : > { %p897_p2 = por %p896_p1, %p895_p0 }
 0x2d6   : > { %687 = vrot.lane.b32.xlu0 %v667_v18, %s962_s5  ;;  %679 = vrot.lane.b32.xlu1 %v665_v19, %s963_s6 }
 0x2d7   : > { %p898_p3 = pnand %p897_p2, %p891_p13 }
 0x2da   : > { %695 = vrot.lane.b32.xlu0 %v669_v22, %s964_s8  ;;  %683 = vrot.lane.b32.xlu1 %v666_v23, %s965_s7 }
 0x2de   : > { %691 = vrot.lane.b32.xlu1 %v668_v24, %s966_s9 }
 0x344   : > { %v676_v25 = vpop.permute.xlu0 %675  ;;  %v672_v26 = vpop.permute.xlu1 %671 }
 0x345   : > { %v698_v27 = vsel %vm445_vm1, %v662_v16, %v672_v26 }
 0x346   : > { %v700_v29 = vsel %vm699_vm2, %v698_v27, %v676_v25 }
 0x348   : > { %v680_v28 = vpop.permute.xlu1 %679  ;;  %v688_v9 = vpop.permute.xlu0 %687 }
 0x349   : > { %v702_v30 = vsel %vm701_vm3, %v700_v29, %v680_v28 }
 0x34c   : > { %v684_v31 = vpop.permute.xlu1 %683  ;;  %v696_v33 = vpop.permute.xlu0 %695 }
 0x34d   : > { %v704_v32 = vsel %vm703_vm4, %v702_v30, %v684_v31 }
 0x34e   : > { %v706_v35 = vsel %vm705_vm5, %v704_v32, %v688_v9 }
 0x350   : > { %v692_v34 = vpop.permute.xlu1 %691 }
 0x351   : > { %v708_v36 = vsel %vm707_vm6, %v706_v35, %v692_v34  ;;  %v710_v37 = vsel %vm709_vm7, %v692_v34, %v696_v33 }
 0x352   : > { %711 = vst [vmem:[%s161_s19] sm:$0xff] %v708_v36  ;;  %713 = vst.msk [vmem:[%s161_s19 + $0x8] sm:$0xff] %vm712_vm8, %v710_v37 }
 0x353   : > { %901 = shalt.err (!%p898_p3)
}
 0x354   : > { %s902_s4 = scalar_lea.hbm %s1198_s26, 256  ;;  %s906_s8 = scalar_lea.hbm %s1242_s3, 1024 }
 0x355   : > { %p903_p4 = scmp.ne.s32.totalorder %s1198_s26, %s902_s4  ;;  %p907_p9 = scmp.lt.s32.totalorder %s1198_s26, %s1242_s3 }
 0x356   : > { %p908_p10 = scmp.lt.s32.totalorder %s906_s8, %s902_s4 }
 0x357   : > { %p904_p7 = pnand %p903_p4, %p1026_p5 }
 0x358   : > { %p909_p11 = por %p908_p10, %p907_p9 }
 0x359   : > { %p905_p8 = pneg %p904_p7 }
 0x35b   : > { %p910_p12 = pnand %p909_p11, %p905_p8 }
 0x35d   : > { %913 = shalt.err (!%p910_p12)
}
 0x35e   : > { %800 = dma.vmem_to_hbm [thread:$0]  (%p1026_p5), %s1200_s20, 256, %s1198_s26, %s715_s16  }
 0x35f PF: > { %p806_p13 = scmp.ge.s32.totalorder %s948_s15, 2  ;;  %s741_s10 = sand.u32 1, %s936_s12  }
 0x360   : > { %s742_s11 = scalar_lea.sflag [#allocation3], %s741_s10 }
 0x361   : > { %p803_p0 = pnand %p806_p13, %p1030_p6 }
 0x363   : > { %p804_p1 = pneg %p803_p0 }
 0x365   : > { %931 = dma.done.wait (%p804_p1), %s742_s11, 256  }
 0x366   : > { %933 = vsyncadd (%p804_p1), %s742_s11, 4294967040  ;;  %p13_p2 = scmp.ge.s32.totalorder %s1013_s18, 6   ;;  %s1245_s12 = smov %s940_s13 }
 0x367   : > { %s1246_s13 = smov %s944_s14  ;;  %s1247_s14 = smov %s1024_s21 }
 0x368   : > { %s1248_s15 = smov %s1013_s18  ;;  %15 = sbr.rel (!%p13_p2) target bundleno = 3 (0x3), region = 67 }
 0x36d   :  { %747 = vsyncpa [#allocation3], 1 }
 0x36e   :  { %749 = vsyncpa [#allocation3 + $0x1], 1 }

</bundles_post_ra>
